<compile_context>
chip_gen: v7x
topology: tpu7x:2x2x1
jax: 0.10.0
libtpu: 0.0.40
codegen_flags: <defaults>
</compile_context>

<pallas_src>
import functools

import jax
import jax.numpy as jnp
from jax.experimental import pallas as pl
from jax.experimental.pallas import tpu as pltpu


def _sublane_align(dtype) -> int:
    """Row-axis (second-minor) alignment: 8 for 4-byte, 16 for 2-byte, 32 for 1-byte."""
    itemsize = jnp.dtype(dtype).itemsize
    return max(8, 32 // max(1, itemsize))


def _tpu_generation_config() -> tuple[int, int, int]:
    """(target_block_bytes, vmem_limit_bytes, min_grid_steps) for the local TPU gen."""
    target_block_bytes = 2 << 20   # v5e / unknown: 2 MiB blocks
    vmem_limit_bytes = 32 << 20    # explicit: v5e scoped default is only 16 MiB
    min_grid_steps = 1
    try:
        kind = jax.devices()[0].device_kind.lower()
    except Exception:  # pragma: no cover - defensive, keep conservative defaults
        kind = ""
    if "v7" in kind:
        # 3.2 TB/s HBM per TC; 64 MiB physical VMEM, 32 MiB scoped default.
        target_block_bytes = 5 << 20
        vmem_limit_bytes = 48 << 20
        min_grid_steps = 2          # 2 TensorCores per chip -> need >= 2 parallel steps
    elif "v6" in kind:
        # 1.4 TB/s HBM; 128 MiB physical VMEM.
        target_block_bytes = 4 << 20
        vmem_limit_bytes = 32 << 20
    return target_block_bytes, vmem_limit_bytes, min_grid_steps


def _pick_tile_rows(rows: int, d_model: int, dtype, *,
                    target_block_bytes: int,
                    vmem_budget_bytes: int,
                    min_grid_steps: int = 1) -> int:
    """Pick a large, sublane-aligned row tile.

    VMEM footprint budgeted per row of tile:
      2 x (input block, double-buffered) + 2 x (output block, double-buffered)
      + ~2 f32 temporaries (the `x.astype(f32)` upcast and the normalized y)
    so sub-32-bit inputs don't silently blow VMEM when blocks are enlarged.
    """
    align = _sublane_align(dtype)
    itemsize = jnp.dtype(dtype).itemsize
    row_bytes = d_model * itemsize
    rows_aligned = -(-rows // align) * align

    footprint_per_row = 4 * row_bytes + 2 * d_model * 4
    cap_by_vmem = max(align, int(vmem_budget_bytes // footprint_per_row) // align * align)
    cap_by_target = max(align, (target_block_bytes // row_bytes) // align * align)
    cap = min(cap_by_vmem, cap_by_target)

    tile = min(cap, rows_aligned)

    # Guarantee >= min_grid_steps grid steps (v7x megacore: a (1,) grid leaves
    # one TensorCore idle) when there are enough rows to split.
    if min_grid_steps > 1 and rows_aligned >= min_grid_steps * align:
        tile = min(tile, max(align, (rows_aligned // min_grid_steps) // align * align))

    # Prefer an aligned tile that divides `rows` exactly (no ragged last block),
    # but ONLY if that costs at most a 2x block shrink. Tiny tiles are the
    # 29%-of-roofline regime; the ragged last block is correct and nearly free.
    floor = max(align, tile // 2)
    t = tile
    while t >= floor:
        if rows % t == 0:
            return t
        t -= align
    return tile


def _rmsnorm_kernel(x_ref, w_ref, o_ref, *, eps: float, inv_d: float):
    # x_ref: (tile_rows, d_model) block; w_ref: (1, d_model) resident block.
    x = x_ref[...].astype(jnp.float32)
    # mean(x^2) = sum(x^2) * (1/d); rsqrt lowers to the EUP slot (free-ish).
    ms = jnp.sum(x * x, axis=-1, keepdims=True) * inv_d
    inv_rms = jax.lax.rsqrt(ms + eps)
    # Match PyTorch semantics exactly: normalize in f32, cast back to the input
    # dtype, then scale by the weight.
    y = (x * inv_rms).astype(o_ref.dtype)
    o_ref[...] = y * w_ref[...].astype(o_ref.dtype)


def rmsnorm(x: jax.Array, weight: jax.Array, eps: float = 1e-5,
            tile_rows: int | None = None) -> jax.Array:
    """RMSNorm over the last axis of x, scaled by `weight` (shape (d_model,))."""
    orig_shape = x.shape
    d_model = orig_shape[-1]
    rows = 1
    for s in orig_shape[:-1]:
        rows *= s

    x2d = x.reshape(rows, d_model)
    w2d = weight.reshape(1, d_model)

    target_block_bytes, vmem_limit_bytes, min_grid_steps = _tpu_generation_config()

    align = _sublane_align(x.dtype)
    if tile_rows is None:
        # Leave ~30% headroom under the scoped-VMEM limit for compiler scratch.
        tile_rows = _pick_tile_rows(
            rows, d_model, x.dtype,
            target_block_bytes=target_block_bytes,
            vmem_budget_bytes=int(vmem_limit_bytes * 0.7),
            min_grid_steps=min_grid_steps)
    assert tile_rows % align == 0, "tile_rows must be a multiple of the sublane alignment"

    # TODO(synk): for d_model < 128 (or not a multiple of 128) the output is
    # lane-sparse (masked vst); a lane-packing restructure (several logical
    # rows per 128-lane slab) is not done here.
    grid = (pl.cdiv(rows, tile_rows),)

    kernel = functools.partial(_rmsnorm_kernel, eps=float(eps),
                               inv_d=1.0 / float(d_model))

    out2d = pl.pallas_call(
        kernel,
        out_shape=jax.ShapeDtypeStruct((rows, d_model), x.dtype),
        grid_spec=pltpu.PrefetchScalarGridSpec(
            num_scalar_prefetch=0,
            grid=grid,
            in_specs=[
                pl.BlockSpec((tile_rows, d_model), lambda i: (i, 0)),
                # Constant block index -> weight stays resident in VMEM,
                # no re-DMA across grid steps.
                pl.BlockSpec((1, d_model), lambda i: (0, 0)),
            ],
            out_specs=pl.BlockSpec((tile_rows, d_model), lambda i: (i, 0)),
        ),
        compiler_params=pltpu.CompilerParams(
            dimension_semantics=("parallel",),     # megacore-shardable row grid
            vmem_limit_bytes=vmem_limit_bytes,
        ),
    )(x2d, w2d)

    return out2d.reshape(orig_shape)


def rmsnorm_ref(x: jax.Array, weight: jax.Array, eps: float = 1e-5) -> jax.Array:
    xf = x.astype(jnp.float32)
    rms = jnp.sqrt(jnp.mean(xf * xf, axis=-1, keepdims=True) + eps)
    out = (xf / rms).astype(x.dtype)
    return out * weight


if __name__ == "__main__":
    key = jax.random.PRNGKey(0)

    # Small demo shape consistent with the module forward: (batch, seq, d_model).
    # d_model=128 keeps the output lane-dense.
    batch, seq, d_model = 2, 8, 128
    x = jax.random.normal(key, (batch, seq, d_model), dtype=jnp.float32)
    weight = jnp.ones((d_model,), dtype=jnp.float32)  # module init: weight = ones

    out = rmsnorm(x, weight, eps=1e-5)
    out = jax.block_until_ready(out)

    ref = rmsnorm_ref(x, weight, eps=1e-5)
    assert out.shape == x.shape and out.dtype == x.dtype
    assert jnp.allclose(out, ref, atol=1e-5, rtol=1e-5), "mismatch vs reference"

    # Exercise the cdiv / ragged-last-block path (rows not divisible by tile).
    x_r = jax.random.normal(jax.random.PRNGKey(1), (3, 5, d_model), dtype=jnp.float32)
    out_r = jax.block_until_ready(rmsnorm(x_r, weight, eps=1e-5, tile_rows=8))
    ref_r = rmsnorm_ref(x_r, weight, eps=1e-5)
    assert jnp.allclose(out_r, ref_r, atol=1e-5, rtol=1e-5), "ragged-grid mismatch"

    # Exercise the sub-32-bit (bf16) path: 16-row sublane alignment + f32-temp
    # VMEM budgeting + non-trivial weight.
    xb = jax.random.normal(jax.random.PRNGKey(2), (4, 16, d_model)).astype(jnp.bfloat16)
    wb = (jnp.arange(d_model, dtype=jnp.float32) * 0.01 + 0.5).astype(jnp.bfloat16)
    out_b = jax.block_until_ready(rmsnorm(xb, wb, eps=1e-5))
    ref_b = rmsnorm_ref(xb, wb, eps=1e-5)
    assert out_b.dtype == jnp.bfloat16
    assert jnp.allclose(out_b.astype(jnp.float32), ref_b.astype(jnp.float32),
                        atol=2e-2, rtol=2e-2), "bf16 mismatch vs reference"

    print("KERNEL_OK")
</pallas_src>

<mosaic_0001>
module attributes {stable_mosaic.version = 11 : i64} {
  func.func @_rmsnorm_kernel(%arg0: i32, %arg1: memref<16x128xf32, #tpu.memory_space<vmem>>, %arg2: memref<1x128xf32, #tpu.memory_space<vmem>>, %arg3: memref<16x128xf32, #tpu.memory_space<vmem>>) attributes {dimension_semantics = [#tpu.dimension_semantics<parallel>], iteration_bounds = array<i64: 1>, scalar_prefetch = 0 : i64, scratch_operands = 0 : i64, tpu.core_type = #tpu.core_type<tc>, window_params = [{transform_indices = @transform_0, window_bounds = array<i64: 16, 128>}, {pipeline_mode = #tpu.pipeline_mode<synchronous>, transform_indices = @transform_1, window_bounds = array<i64: 1, 128>}, {transform_indices = @transform_2, window_bounds = array<i64: 16, 128>}]} {
    %c0 = arith.constant 0 : index
    %c0_0 = arith.constant 0 : index
    %0 = vector.load %arg1[%c0, %c0_0] : memref<16x128xf32, #tpu.memory_space<vmem>>, vector<16x128xf32>
    %1 = arith.mulf %0, %0 : vector<16x128xf32>
    %cst = arith.constant dense<0.000000e+00> : vector<16xf32>
    %2 = vector.multi_reduction <add>, %1, %cst [1] : vector<16x128xf32> to vector<16xf32>
    %3 = vector.shape_cast %2 : vector<16xf32> to vector<16x1xf32>
    %cst_1 = arith.constant 7.812500e-03 : f32
    %4 = vector.broadcast %cst_1 : f32 to vector<16x1xf32>
    %5 = arith.mulf %3, %4 : vector<16x1xf32>
    %cst_2 = arith.constant 9.99999974E-6 : f32
    %6 = vector.broadcast %cst_2 : f32 to vector<16x1xf32>
    %7 = arith.addf %5, %6 : vector<16x1xf32>
    %8 = math.rsqrt %7 : vector<16x1xf32>
    %9 = vector.broadcast %8 : vector<16x1xf32> to vector<16x128xf32>
    %10 = arith.mulf %0, %9 : vector<16x128xf32>
    %c0_3 = arith.constant 0 : index
    %c0_4 = arith.constant 0 : index
    %11 = vector.load %arg2[%c0_3, %c0_4] : memref<1x128xf32, #tpu.memory_space<vmem>>, vector<1x128xf32>
    %12 = vector.broadcast %11 : vector<1x128xf32> to vector<16x128xf32>
    %13 = arith.mulf %10, %12 : vector<16x128xf32>
    %c0_5 = arith.constant 0 : index
    %c0_6 = arith.constant 0 : index
    %14 = vector.load %arg3[%c0_5, %c0_6] : memref<16x128xf32, #tpu.memory_space<vmem>>, vector<16x128xf32>
    tpu.vector_store %arg3[%c0_5, %c0_6], %13 {strides = array<i32>} : memref<16x128xf32, #tpu.memory_space<vmem>>, vector<16x128xf32>,
    return
  }
  func.func @transform_0(%arg0: i32) -> (i32, i32) {
    %c0_i32 = arith.constant 0 : i32
    %c0_i32_0 = arith.constant 0 : i32
    return %arg0, %c0_i32 : i32, i32
  }
  func.func @transform_1(%arg0: i32) -> (i32, i32) {
    %c0_i32 = arith.constant 0 : i32
    %c0_i32_0 = arith.constant 0 : i32
    %c0_i32_1 = arith.constant 0 : i32
    return %c0_i32, %c0_i32_0 : i32, i32
  }
  func.func @transform_2(%arg0: i32) -> (i32, i32) {
    %c0_i32 = arith.constant 0 : i32
    %c0_i32_0 = arith.constant 0 : i32
    return %arg0, %c0_i32 : i32, i32
  }
}

</mosaic_0001>

<bundles_post_ra>
// kernel: tpu_custom_call.1
= control target key start
LH: loop header
LB: loop body
LE: loop exit
PB: predicated region body
PF: predicated region fallthrough
CT: control target
= control target key end

     0   :  { %7 = vsyncpa [#allocation3], 0  ;;  %s179_s0 = inlined_call_operand.hbm [shape: f32[16,128], index: 0, kind: input, shape index: {}]   ;;  %s180_s1 = inlined_call_operand.vmem [shape: f32[1,128], index: 1, kind: input, shape index: {}]   ;;  %s181_s2 = inlined_call_operand.hbm [shape: f32[16,128], index: 2, kind: output, shape index: {}]  }
   0x1   :  { %8 = vsyncpa [#allocation4], 0  ;;  %s127_s9 = smov [#allocation2]   ;;  %s79_s13 = scalar_lea.hbm %s179_s0, 256 }
   0x2   :  { %s14_s10 = sshll.u32 %s127_s9, 4  ;;  %p80_p0 = scmp.ne.s32.totalorder %s179_s0, %s79_s13  ;;  %s15_s10 = int_to_ptr.vmem [resolvable:$true] %s14_s10 }
   0x3   :  { %p83_p1 = scmp.lt.u32.totalorder %s79_s13, %s179_s0 }
   0x5   :  { %p85_p2 = pnand %p83_p1, %p80_p0 }
   0x7   :  { %88 = shalt.err (!%p85_p2)
}
   0x8   :  { %s89_s18 = scalar_lea.vmem %s15_s10, 256  ;;  %p94_p4 = scmp.lt.s32.totalorder %s15_s10, %s15_s10 }
   0x9   :  { %p90_p3 = scmp.ne.s32.totalorder %s15_s10, %s89_s18  ;;  %p95_p5 = scmp.lt.s32.totalorder %s89_s18, %s89_s18 }
   0xb   :  { %p96_p6 = por %p95_p5, %p94_p4 }
   0xd   :  { %p97_p7 = pnand %p96_p6, %p90_p3 }
   0xf   :  { %100 = shalt.err (!%p97_p7)
}
  0x10   :  { %s128_s19 = smov 128   ;;  %s129_s20 = smov 8  }
  0x11   :  { %20 = dma.hbm_to_vmem [thread:$0]  %s179_s0, 256, %s15_s10, [#allocation3], %s128_s19, %s128_s19, %s129_s20  }
  0x12   :  { %123 = dma.done.wait [#allocation3], 256  }
  0x13   :  { %124 = vsyncadd [#allocation3], 4294967040  ;;  %v26_v0 = vld [vmem:[#allocation2] sm:$0xff]  ;;  %v27_v1 = vld [vmem:[#allocation2 + $0x8] sm:$0xff]  ;;  %s130_s0 = smov [#allocation5]  }
  0x14   :  { %v28_v2 = vmul.f32 %v26_v0, %v26_v0  ;;  %v29_v3 = vmul.f32 %v27_v1, %v27_v1  ;;  %v70_v11 = vld [vmem:[%s180_s1] ss:$0 sm:$0xff]  ;;  %s58_s25 = sshll.u32 %s130_s0, 4  ;;  %s59_s25 = int_to_ptr.vmem [resolvable:$true] %s58_s25 }
  0x15   :  { %s101_s26 = scalar_lea.vmem %s59_s25, 256  ;;  %p106_p9 = scmp.lt.s32.totalorder %s59_s25, %s59_s25 }
  0x16   :  { %30 = vadd.xlane.f32.xlu0 %v28_v2  ;;  %p102_p8 = scmp.ne.s32.totalorder %s59_s25, %s101_s26  ;;  %p107_p10 = scmp.lt.s32.totalorder %s101_s26, %s101_s26 }
  0x18   :  { %p108_p11 = por %p107_p10, %p106_p9 }
  0x1a   :  { %32 = vadd.xlane.f32.xlu0 %v29_v3  ;;  %p109_p12 = pnand %p108_p11, %p102_p8 }
  0xa3   :  { %v31_v4 = vpop.xlane.xlu0 %30 }
  0xa4   :  { %v34_v5 = vmul.f32 0.0078125, %v31_v4 }
  0xa6   :  { %v36_v6 = vadd.f32 1e-05, %v34_v5 }
  0xa7   :  { %v33_v7 = vpop.xlane.xlu0 %32 }
  0xa8   :  { %75 = vrsqrt.f32 %v36_v6  ;;  %v35_v8 = vmul.f32 0.0078125, %v33_v7 }
  0xaa   :  { %v37_v9 = vadd.f32 1e-05, %v35_v8 }
  0xac   :  { %77 = vrsqrt.f32 %v37_v9 }
  0xb2   :  { %v76_v10 = vpop.eup %75 }
  0xb3   :  { %v40_v12 = vmul.f32 %v76_v10, %v26_v0 }
  0xb5   :  { %v49_v13 = vmul.f32 %v70_v11, %v40_v12 }
  0xb6   :  { %v78_v14 = vpop.eup %77 }
  0xb7   :  { %v41_v15 = vmul.f32 %v78_v14, %v27_v1  ;;  %51 = vst [vmem:[#allocation5] sm:$0xff] %v49_v13 }
  0xb9   :  { %v50_v16 = vmul.f32 %v70_v11, %v41_v15 }
  0xbb   :  { %52 = vst [vmem:[#allocation5 + $0x8] sm:$0xff] %v50_v16 }
  0xbc   :  { %112 = shalt.err (!%p109_p12)
}
  0xbd   :  { %s113_s1 = scalar_lea.hbm %s181_s2, 256 }
  0xbe   :  { %p114_p13 = scmp.ne.s32.totalorder %s181_s2, %s113_s1  ;;  %p117_p0 = scmp.lt.u32.totalorder %s113_s1, %s181_s2 }
  0xc0   :  { %p119_p1 = pnand %p117_p0, %p114_p13 }
  0xc2   :  { %122 = shalt.err (!%p119_p1)
}
  0xc3   :  { %64 = dma.vmem_to_hbm [thread:$0]  %s59_s25, 256, %s181_s2, [#allocation4], %s128_s19, %s128_s19, %s129_s20  }
  0xc4   :  { %125 = dma.done.wait [#allocation4], 256  }
  0xc5   :  { %126 = vsyncadd [#allocation4], 4294967040 }
  0xc6   :  { %68 = vsyncpa [#allocation3], 1 }
  0xc7   :  { %69 = vsyncpa [#allocation4], 1 }

</bundles_post_ra>
